<compile_context>
chip_gen: v7x
topology: tpu7x:2x2x1
jax: 0.10.0
libtpu: 0.0.40
codegen_flags: <defaults>
</compile_context>

<pallas_src>
import functools

import jax
import jax.numpy as jnp
from jax import lax
from jax.experimental import pallas as pl
from jax.experimental.pallas import tpu as pltpu

_LANES = 128
_TARGET_BLOCK_BYTES = 2 << 20   # ~2 MiB blocks: >85% of HBM roofline, <10% step overhead
_MAX_BLOCK_BYTES = 4 << 20      # keep double-buffered in+out <= ~16 MiB (v7x-safe)

# tanh-based approximation of Phi(sqrt(2)*x) = (1 + erf(x)) / 2 (GELU-style):
#   0.5 * (1 + tanh(x * (2/sqrt(pi) + 0.044715 * 4/sqrt(pi) * x^2)))
_C1 = 1.1283791670955126    # 2/sqrt(pi)
_C3 = 0.10091075332714511   # 0.044715 * 4/sqrt(pi)


def _cdiv(a, b):
    return -(-a // b)


def _round_up(x, m):
    return _cdiv(x, m) * m


def _sublane_pack(dtype):
    # Sub-32-bit dtypes pack along sublanes; keep row tiles full-width packed.
    return {1: 32, 2: 16, 4: 8}.get(jnp.dtype(dtype).itemsize, 8)


def _gauss_cdf_kernel(x_ref, o_ref, *, approx, compute_dtype):
    x = x_ref[...].astype(compute_dtype)
    if approx:
        # EUP-offloaded path: single tanh per element instead of the ~20-op
        # VALU erf polynomial (helps only when VALU-bound, e.g. v7x).
        t = jnp.tanh(x * (_C1 + _C3 * (x * x)))
        y = 0.5 * (1.0 + t)
    else:
        y = 0.5 * (1.0 + lax.erf(x))
    o_ref[...] = y.astype(o_ref.dtype)


def _pick_block_rows(rows, pack, bytes_per_row):
    """Rows per block: ~2 MiB (<=4 MiB), pack-aligned, >=2 blocks when possible."""
    target = max(pack, (_TARGET_BLOCK_BYTES // bytes_per_row) // pack * pack)
    cap = max(pack, (_MAX_BLOCK_BYTES // bytes_per_row) // pack * pack)
    target = min(target, cap)
    if rows <= target:
        if rows >= 2 * pack:
            # Split even tiny-ish arrays into 2 blocks so both v7x TCs work.
            return _round_up(_cdiv(rows, 2), pack)
        return rows  # single block == full extent (no alignment requirement)
    nblk = _cdiv(rows, target)
    if nblk % 2 == 1 and nblk <= 16:
        nblk += 1    # prefer even block counts for balanced 2-TC sharding
    return min(target, _round_up(_cdiv(rows, nblk), pack))


def gaussian_cdf_activation(x, *, approx=False, compute_dtype=jnp.float32):
    """y = (1 + erf(x)) / 2 elementwise via a Pallas TPU kernel.

    x: any-shape float array (e.g. NCHW). Returns same shape/dtype.
    approx=True uses an EUP-friendly tanh approximation (opt-in fast path).
    """
    orig_shape = x.shape
    dtype = x.dtype
    n = int(x.size)
    itemsize = jnp.dtype(dtype).itemsize
    pack = _sublane_pack(dtype)
    bytes_per_row = _LANES * itemsize

    kernel = functools.partial(
        _gauss_cdf_kernel, approx=approx, compute_dtype=compute_dtype)

    cost = pl.CostEstimate(
        flops=(10 if approx else 20) * n,
        transcendentals=(n if approx else 0),   # f32 erf is a pure VALU polynomial
        bytes_accessed=2 * n * itemsize,
    )
    cparams = pltpu.CompilerParams(
        dimension_semantics=("parallel",),
        vmem_limit_bytes=32 << 20,
    )

    rows = _cdiv(n, _LANES)
    tr = _pick_block_rows(rows, pack, bytes_per_row)

    if n % _LANES == 0:
        # Aligned common case: lane-dense (rows, 128) slab, (tr, 128) blocks.
        x2d = x.reshape(rows, _LANES)
        out2d = pl.pallas_call(
            kernel,
            out_shape=jax.ShapeDtypeStruct((rows, _LANES), dtype),
            grid_spec=pl.GridSpec(
                grid=(_cdiv(rows, tr),),
                in_specs=[pl.BlockSpec((tr, _LANES), lambda i: (i, 0))],
                out_specs=pl.BlockSpec((tr, _LANES), lambda i: (i, 0)),
            ),
            compiler_params=cparams,
            cost_estimate=cost,
        )(x2d)
        return out2d.reshape(orig_shape)

    # Unaligned: flat 1-D slab, no jnp.pad / slice HBM round-trips.
    x1d = jnp.ravel(x)
    if tr >= rows:
        blk, grid = (n,), (1,)              # single full-array block, no masking
    else:
        blk_elems = tr * _LANES             # multiple of 1024 (pack>=8)
        blk, grid = (blk_elems,), (_cdiv(n, blk_elems),)  # ragged tail masked
    out1d = pl.pallas_call(
        kernel,
        out_shape=jax.ShapeDtypeStruct((n,), dtype),
        grid_spec=pl.GridSpec(
            grid=grid,
            in_specs=[pl.BlockSpec(blk, lambda i: (i,))],
            out_specs=pl.BlockSpec(blk, lambda i: (i,))),
        compiler_params=cparams,
        cost_estimate=cost,
    )(x1d)
    return out1d.reshape(orig_shape)


if __name__ == "__main__":
    key = jax.random.PRNGKey(0)

    # Small NCHW input consistent with a conv-style activation usage.
    x = jax.random.normal(key, (2, 4, 16, 16), dtype=jnp.float32)
    y = jax.block_until_ready(gaussian_cdf_activation(x))
    y_ref = (1.0 + lax.erf(x)) / 2.0
    assert y.shape == x.shape and y.dtype == x.dtype
    assert jnp.max(jnp.abs(y - y_ref)) < 1e-6

    # Non-128-aligned bf16 input exercises the flat 1-D (pad-free) path.
    x2 = jax.random.normal(jax.random.PRNGKey(1), (3, 5, 7, 11)).astype(jnp.bfloat16)
    y2 = jax.block_until_ready(gaussian_cdf_activation(x2))
    y2_ref = ((1.0 + lax.erf(x2.astype(jnp.float32))) / 2.0).astype(jnp.bfloat16)
    assert y2.shape == x2.shape and y2.dtype == x2.dtype
    assert jnp.max(jnp.abs(y2.astype(jnp.float32) - y2_ref.astype(jnp.float32))) < 1e-2

    # Opt-in EUP-approx fast path (tanh-based), looser tolerance.
    y3 = jax.block_until_ready(gaussian_cdf_activation(x, approx=True))
    assert jnp.max(jnp.abs(y3 - y_ref)) < 1e-2

    print("KERNEL_OK")
</pallas_src>

<mosaic_0001>
module attributes {stable_mosaic.version = 11 : i64} {
  func.func @_gauss_cdf_kernel(%arg0: i32, %arg1: memref<8x128xf32, #tpu.memory_space<vmem>>, %arg2: memref<8x128xf32, #tpu.memory_space<vmem>>) attributes {dimension_semantics = [#tpu.dimension_semantics<parallel>], iteration_bounds = array<i64: 2>, scalar_prefetch = 0 : i64, scratch_operands = 0 : i64, tpu.core_type = #tpu.core_type<tc>, window_params = [{transform_indices = @transform_0, window_bounds = array<i64: 8, 128>}, {transform_indices = @transform_1, window_bounds = array<i64: 8, 128>}]} {
    %c0 = arith.constant 0 : index
    %c0_0 = arith.constant 0 : index
    %0 = vector.load %arg1[%c0, %c0_0] : memref<8x128xf32, #tpu.memory_space<vmem>>, vector<8x128xf32>
    %1 = math.erf %0 : vector<8x128xf32>
    %cst = arith.constant 1.000000e+00 : f32
    %2 = vector.broadcast %cst : f32 to vector<8x128xf32>
    %3 = arith.addf %2, %1 : vector<8x128xf32>
    %cst_1 = arith.constant 5.000000e-01 : f32
    %4 = vector.broadcast %cst_1 : f32 to vector<8x128xf32>
    %5 = arith.mulf %4, %3 : vector<8x128xf32>
    %c0_2 = arith.constant 0 : index
    %c0_3 = arith.constant 0 : index
    %6 = vector.load %arg2[%c0_2, %c0_3] : memref<8x128xf32, #tpu.memory_space<vmem>>, vector<8x128xf32>
    tpu.vector_store %arg2[%c0_2, %c0_3], %5 {strides = array<i32>} : memref<8x128xf32, #tpu.memory_space<vmem>>, vector<8x128xf32>,
    return
  }
  func.func @transform_0(%arg0: i32) -> (i32, i32) {
    %c0_i32 = arith.constant 0 : i32
    %c0_i32_0 = arith.constant 0 : i32
    return %arg0, %c0_i32 : i32, i32
  }
  func.func @transform_1(%arg0: i32) -> (i32, i32) {
    %c0_i32 = arith.constant 0 : i32
    %c0_i32_0 = arith.constant 0 : i32
    return %arg0, %c0_i32 : i32, i32
  }
}

</mosaic_0001>

<bundles_post_ra>
// kernel: tpu_custom_call.1
= control target key start
LH: loop header
LB: loop body
LE: loop exit
PB: predicated region body
PF: predicated region fallthrough
CT: control target
= control target key end

     0   :  { %6 = vsyncpa [#allocation3], 0  ;;  %s552_s0 = inlined_call_operand.hbm [shape: f32[16,128], index: 0, kind: input, shape index: {}]   ;;  %s553_s1 = inlined_call_operand.hbm [shape: f32[16,128], index: 1, kind: output, shape index: {}]  }
   0x1   :  { %8 = vsyncpa [#allocation3 + $0x1], 0 }
   0x2   :  { %9 = vsyncpa [#allocation4], 0 }
   0x3   :  { %11 = vsyncpa [#allocation4 + $0x1], 0  ;;  %s391_s6 = smov 0   ;;  %s393_s7 = smov 0  }
   0x4   :  { %s395_s8 = smov 0   ;;  %s397_s9 = smov 0  }
   0x5 LB: > { %s412_s10 = sadd.s32 4294967295, %s377_s9   ;;  %s221_s11 = sadd.s32 4294967294, %s377_s9   ;;  %s377_s9 = sphi %s397_s9, %s568_s9   ;;  %s373_s8 = sphi %s395_s8, %s567_s8   ;;  %s369_s7 = sphi %s393_s7, %s566_s7   ;;  %s365_s6 = sphi %s391_s6, %s565_s6  }
   0x6   : > { %s416_s12 = sadd.s32 1, %s377_s9   ;;  %s24_s13 = sadd.s32 1, %s373_s8 }
   0x7   : > { %s21_s14 = ssub.s32 %s377_s9, %s416_s12  ;;  %p31_p0 = scmp.ne.s32.totalorder %s373_s8, %s369_s7 }
   0x8   : > { %p22_p1 = scmp.eq.s32.totalorder %s21_s14, 0  ;;  %p32_p2 = scmp.eq.s32.totalorder %s377_s9, 0 }
   0x9   : > { %p37_p3 = scmp.ne.s32.totalorder %s369_s7, %s365_s6  ;;  %p38_p4 = scmp.eq.s32.totalorder %s412_s10, 0 }
   0xa   : > { %s428_s15 = scalar_select %p22_p1, %s373_s8, %s24_s13  }
   0xb   : > { %p430_p5 = por %p32_p2, %p31_p0  ;;  %p434_p6 = por %p38_p4, %p37_p3 }
   0xc   : > { %p61_p7 = scmp.eq.s32.totalorder %s412_s10, 1  ;;  %p67_p8 = scmp.eq.s32.totalorder %s221_s11, 1 }
   0xd   : > { %p245_p10 = scmp.lt.s32.totalorder %s377_s9, 2  ;;  %s87_s20 = sand.u32 1, %s373_s8  }
   0xe   : > { %p441_p11 = por %p61_p7, %p31_p0  ;;  %p445_p12 = por %p67_p8, %p37_p3 }
   0xf   : > { %s225_s21 = sshll.u32 %s377_s9, 7  ;;  %s224_s22 = sshll.u32 %s87_s20, 3 }
  0x10   : > { %s557_s18 = scalar_select %p441_p11, 1, 0 }
  0x11   : > { %s558_s19 = scalar_select %p445_p12, 1, 0 }
  0x12   : > { %s454_s25 = scalar_lea.hbm %s552_s0, %s225_s21  ;;  %s91_s26 = scalar_lea.vmem [#allocation2], %s224_s22 }
  0x13   : > { %s98_s27 = sshll.u32 %s91_s26, 4  ;;  %p458_p13 = pnand %p245_p10, %p430_p5  ;;  %s462_s27 = int_to_ptr.vmem [resolvable:$true] %s98_s27 }
  0x14   : > { %s88_s29 = scalar_lea.sflag [#allocation3], %s87_s20  ;;  %s281_s30 = scalar_lea.hbm %s454_s25, 128 }
  0x15   : > { %p282_p2 = scmp.ne.s32.totalorder %s454_s25, %s281_s30  ;;  %p283_p3 = pneg %p458_p13 }
  0x16   : > { %s286_s4 = scalar_lea.hbm %s552_s0, 256  ;;  %p287_p5 = scmp.lt.u32.totalorder %s454_s25, %s552_s0 }
  0x17   : > { %p284_p4 = pnand %p283_p3, %p282_p2  ;;  %p288_p8 = scmp.lt.u32.totalorder %s286_s4, %s281_s30 }
  0x18   : > { %p290_p9 = scmp.lt.u32.totalorder %s281_s30, %s454_s25 }
  0x19   : > { %p285_p7 = pneg %p284_p4  ;;  %p289_p10 = por %p288_p8, %p287_p5 }
  0x1b   : > { %p291_p0 = por %p290_p9, %p289_p10 }
  0x1d   : > { %p292_p1 = pnand %p291_p0, %p285_p7 }
  0x1f   : > { %295 = shalt.err (!%p292_p1)
}
  0x20   : > { %s296_s13 = scalar_lea.vmem %s462_s27, 128  ;;  %s379_s14 = smov [#allocation2]  }
  0x21   : > { %p297_p2 = scmp.ne.s32.totalorder %s462_s27, %s296_s13  ;;  %s301_s16 = sshll.u32 %s379_s14, 4  ;;  %s302_s16 = int_to_ptr.vmem [resolvable:$false] %s301_s16 }
  0x22   : > { %s303_s20 = scalar_lea.vmem %s302_s16, 256  ;;  %p304_p11 = scmp.lt.s32.totalorder %s462_s27, %s302_s16 }
  0x23   : > { %p299_p4 = pnand %p297_p2, %p283_p3  ;;  %p305_p5 = scmp.lt.s32.totalorder %s303_s20, %s296_s13 }
  0x25   : > { %p300_p12 = pneg %p299_p4  ;;  %p306_p8 = por %p305_p5, %p304_p11 }
  0x27   : > { %p307_p9 = pnand %p306_p8, %p300_p12 }
  0x29   : > { %310 = shalt.err (!%p307_p9)
}
  0x2a   : > { %240 = dma.hbm_to_vmem [thread:$0]  (!%p458_p13), %s454_s25, 128, %s462_s27, %s88_s29  }
  0x2b   : > { %p560_p0 = scmp.lt.s32.totalorder %s377_s9, 3  ;;  %p561_p1 = scmp.ge.s32.totalorder %s377_s9, 1 }
  0x2d   : > { %p104_p3 = pnand %p561_p1, %p560_p0 }
  0x2e   : > { %s496_s21 = sand.u32 (!%p104_p3), 1, %s369_s7  }
  0x2f   : > { %107 = sbr.rel (%p104_p3) target bundleno = 85 (0x55), region = 24  ;;  %s227_s22 = sshll.u32 (!%p104_p3), %s496_s21, 3 }
  0x30   : > { %s110_s23 = scalar_lea.sflag (!%p104_p3), [#allocation3], %s496_s21  ;;  %s113_s24 = scalar_lea.vmem (!%p104_p3), [#allocation2], %s227_s22 }
  0x36   : > { %356 = dma.done.wait (%p434_p6), %s110_s23, 128  }
  0x37   : > { %358 = vsyncadd (%p434_p6), %s110_s23, 4294967168  ;;  %v132_v0 = vld [vmem:[%s113_s24] sm:$0xff]  ;;  %s131_s25 = scalar_lea.vmem [#allocation5], %s227_s22  ;;  %s230_s27 = sshll.u32 %s412_s10, 7 }
  0x38   : > { %279 = verf.f32 %v132_v0  ;;  %s151_s26 = sshll.u32 %s131_s25, 4  ;;  %s510_s17 = scalar_lea.hbm %s553_s1, %s230_s27  ;;  %s505_s26 = int_to_ptr.vmem [resolvable:$true] %s151_s26 }
  0x39   : > { %s138_s30 = scalar_lea.sflag [#allocation4], %s496_s21  ;;  %s311_s2 = scalar_lea.vmem %s505_s26, 128 }
  0x3a   : > { %p312_p6 = scmp.ne.s32.totalorder %s505_s26, %s311_s2  ;;  %p562_p11 = scmp.ne.s32.totalorder %s557_s18, 0 }
  0x3b   : > { %s380_s10 = smov [#allocation5]  }
  0x3c   : > { %p313_p12 = pnand %p312_p6, %p562_p11  ;;  %s315_s3 = sshll.u32 %s380_s10, 4  ;;  %s316_s3 = int_to_ptr.vmem [resolvable:$false] %s315_s3 }
  0x3d   : > { %s317_s4 = scalar_lea.vmem %s316_s3, 256  ;;  %p318_p7 = scmp.lt.s32.totalorder %s505_s26, %s316_s3 }
  0x3e   : > { %p314_p13 = pneg %p313_p12  ;;  %p319_p10 = scmp.lt.s32.totalorder %s317_s4, %s311_s2 }
  0x40   : > { %p320_p2 = por %p319_p10, %p318_p7 }
  0x42   : > { %v280_v1 = vpop.eup %279  ;;  %p321_p4 = pnand %p320_p2, %p314_p13 }
  0x43   : > { %v134_v2 = vadd.f32 1.0, %v280_v1 }
  0x45   : > { %v135_v3 = vmul.f32 0.5, %v134_v2 }
  0x47   : > { %136 = vst [vmem:[%s131_s25] sm:$0xff] %v135_v3 }
  0x48   : > { %324 = shalt.err (!%p321_p4)
}
  0x49   : > { %s325_s5 = scalar_lea.hbm %s510_s17, 128  ;;  %s329_s14 = scalar_lea.hbm %s553_s1, 256 }
  0x4a   : > { %p326_p5 = scmp.ne.s32.totalorder %s510_s17, %s325_s5  ;;  %p330_p0 = scmp.lt.u32.totalorder %s510_s17, %s553_s1 }
  0x4b   : > { %p331_p1 = scmp.lt.u32.totalorder %s329_s14, %s325_s5  ;;  %p333_p6 = scmp.lt.u32.totalorder %s325_s5, %s510_s17 }
  0x4c   : > { %p327_p8 = pnand %p326_p5, %p562_p11 }
  0x4d   : > { %p332_p3 = por %p331_p1, %p330_p0 }
  0x4e   : > { %p328_p9 = pneg %p327_p8 }
  0x4f   : > { %p334_p12 = por %p333_p6, %p332_p3 }
  0x51   : > { %p335_p13 = pnand %p334_p12, %p328_p9 }
  0x53   : > { %338 = shalt.err (!%p335_p13)
}
  0x54   : > { %235 = dma.vmem_to_hbm [thread:$0]  (%p562_p11), %s505_s26, 128, %s510_s17, %s138_s30  }
  0x55 PF: > { %s163_s21 = sand.u32 1, %s365_s6   ;;  %p563_p7 = scmp.ne.s32.totalorder %s558_s19, 0 }
  0x56   : > { %p564_p10 = scmp.ge.s32.totalorder %s377_s9, 2  ;;  %s164_s22 = scalar_lea.sflag [#allocation4], %s163_s21 }
  0x58   : > { %p242_p2 = pnand %p564_p10, %p563_p7 }
  0x5a   : > { %360 = dma.done.wait (!%p242_p2), %s164_s22, 128  }
  0x5b   : > { %362 = vsyncadd (!%p242_p2), %s164_s22, 4294967168  ;;  %p14_p4 = scmp.ge.s32.totalorder %s416_s12, 4   ;;  %s565_s6 = smov %s369_s7 }
  0x5c   : > { %s566_s7 = smov %s373_s8  ;;  %s567_s8 = smov %s428_s15 }
  0x5d   : > { %s568_s9 = smov %s416_s12  ;;  %16 = sbr.rel (!%p14_p4) target bundleno = 5 (0x5), region = 69 }
  0x64   :  { %169 = vsyncpa [#allocation3], 1 }
  0x65   :  { %171 = vsyncpa [#allocation3 + $0x1], 1 }
  0x66   :  { %172 = vsyncpa [#allocation4], 1 }
  0x67   :  { %174 = vsyncpa [#allocation4 + $0x1], 1 }

</bundles_post_ra>
